<compile_context>
chip_gen: v7x
topology: tpu7x:2x2x1
jax: 0.10.0
libtpu: 0.0.40
codegen_flags: <defaults>
</compile_context>

<pallas_src>
import jax
import jax.numpy as jnp
from jax.experimental import pallas as pl
from jax.experimental.pallas import tpu as pltpu

DOWNSAMPLE = 320  # HubertWithKmeans.downsample_factor
_PAD_DIST = 1.0e30  # effective distance for padded (dummy) cluster columns


def _round_up(x, m):
    return (x + m - 1) // m * m


def _kmeans_assign_kernel(frames_ref, wp_ref, c2_ref, out_ref):
    # frames_ref: (1, tS, F)  bf16   one (batch, seq-tile) block of 320-sample frames
    # wp_ref:     (F, Cp)     bf16   fused projection: w_feat @ centers.T (C padded to 128x)
    # c2_ref:     (1, Cp)     f32    ||center||^2, padded columns = _PAD_DIST
    # out_ref:    (1, 1, tS)  i32    cluster assignments for this block
    x = frames_ref[0]                                                      # (tS, F)

    # Single MXU pass: e.c for every center, without materializing the embedding.
    scores = jnp.dot(x, wp_ref[...], preferred_element_type=jnp.float32)   # (tS, Cp)

    # Squared distance up to a per-row constant: ||c||^2 - 2 e.c  (monotone-equivalent
    # to -cdist, so the argmin matches PyTorch's argmax of -cdist).
    d = c2_ref[...] - 2.0 * scores                                         # (tS, Cp)

    # argmin with first-occurrence tie-break (matches argmax-of-negated-distance).
    mn = jnp.min(d, axis=-1, keepdims=True)                                # (tS, 1)
    idx = jax.lax.broadcasted_iota(jnp.int32, d.shape, 1)                  # (tS, Cp)
    cand = jnp.where(d == mn, idx, jnp.int32(d.shape[1]))
    clusters = jnp.min(cand, axis=-1).astype(jnp.int32)                    # (tS,)

    out_ref[...] = clusters.reshape(1, 1, -1)


def hubert_with_kmeans_forward(wav, w_feat, cluster_centers,
                               seq_len_multiple_of=None, flatten=True):
    """Forward pass of HubertWithKmeans (flatten=True path): wav [B, T] -> clusters [B, S] int32."""
    # curtail_to_multiple (glue, matches the PyTorch helper)
    if seq_len_multiple_of is not None:
        T = wav.shape[-1]
        wav = wav[..., : T // seq_len_multiple_of * seq_len_multiple_of]

    B, T = wav.shape
    S = T // DOWNSAMPLE
    if S <= 0:
        raise ValueError(f"waveform too short: T={T} < downsample_factor={DOWNSAMPLE}")
    frames = wav[:, : S * DOWNSAMPLE].reshape(B, S, DOWNSAMPLE)            # (B, S, 320) f32

    F = DOWNSAMPLE
    C, D = cluster_centers.shape
    assert w_feat.shape == (F, D), (w_feat.shape, (F, D))

    # ---- wrapper-side fusion of the two matmuls (grid-invariant, done once) ----
    wp = jnp.dot(w_feat, cluster_centers.T)                                # (F, C) f32
    c2 = jnp.sum(cluster_centers * cluster_centers, axis=-1)               # (C,)   f32

    # Pad the cluster dim to a multiple of 128 (full MXU columns / lane vregs);
    # dummy centers get a huge distance so they never win the argmin.
    Cp = _round_up(C, 128)
    if Cp > C:
        wp = jnp.pad(wp, ((0, 0), (0, Cp - C)))
        c2 = jnp.pad(c2, (0, Cp - C), constant_values=_PAD_DIST)
    c2 = c2.reshape(1, Cp).astype(jnp.float32)

    # Pad the sequence to a 128-aligned tile size (lane-dense int32 output stores).
    tS = min(512, _round_up(S, 128))
    Sp = _round_up(S, tS)
    if Sp > S:
        frames = jnp.pad(frames, ((0, 0), (0, Sp - S), (0, 0)))

    # bf16 operands for the MXU; accumulation stays f32 inside the kernel.
    frames_bf = frames.astype(jnp.bfloat16)                                # (B, Sp, F)
    wp_bf = wp.astype(jnp.bfloat16)                                        # (F, Cp)

    n_s_tiles = Sp // tS
    out = pl.pallas_call(
        _kmeans_assign_kernel,
        out_shape=jax.ShapeDtypeStruct((B, 1, Sp), jnp.int32),
        grid_spec=pltpu.PrefetchScalarGridSpec(
            num_scalar_prefetch=0,
            grid=(B, n_s_tiles),
            in_specs=[
                pl.BlockSpec((1, tS, F), lambda b, s: (b, s, 0)),   # per-(batch, seq-tile) frames
                pl.BlockSpec((F, Cp), lambda b, s: (0, 0)),         # fused projection (resident)
                pl.BlockSpec((1, Cp), lambda b, s: (0, 0)),         # center norms (resident)
            ],
            out_specs=pl.BlockSpec((1, 1, tS), lambda b, s: (b, 0, s)),
        ),
        compiler_params=pltpu.CompilerParams(
            dimension_semantics=("parallel", "parallel"),
            vmem_limit_bytes=32 * 1024 * 1024,
        ),
    )(frames_bf, wp_bf, c2)

    clusters = out.reshape(B, Sp)[:, :S]
    # flatten=True returns (b, s) cluster ids; flatten=False rearranges 'b ... -> b (...)'
    # which is identical for a 2-D result.
    return clusters


if __name__ == "__main__":
    key = jax.random.PRNGKey(0)
    k_wav, k_w, k_c = jax.random.split(key, 3)

    B = 2
    S = 8
    T = S * DOWNSAMPLE + 37     # not a multiple of 320; framing drops the remainder
    D = 32                      # embedding dim (small stand-in for HuBERT's 768)
    C = 16                      # codebook_size (small stand-in for kmeans.n_clusters)

    wav = jax.random.normal(k_wav, (B, T), dtype=jnp.float32)
    # deterministic synthetic parameters (no checkpoint / kmeans file loading)
    w_feat = jax.random.normal(k_w, (DOWNSAMPLE, D), dtype=jnp.float32) * 0.05
    cluster_centers = jax.random.normal(k_c, (C, D), dtype=jnp.float32)

    clusters = hubert_with_kmeans_forward(wav, w_feat, cluster_centers)
    jax.block_until_ready(clusters)

    assert clusters.shape == (B, S), clusters.shape
    assert clusters.dtype == jnp.int32
    assert bool(jnp.all((clusters >= 0) & (clusters < C)))
    print("KERNEL_OK")
</pallas_src>

<mosaic_0001>
module attributes {stable_mosaic.version = 11 : i64} {
  func.func @_kmeans_assign_kernel(%arg0: i32, %arg1: i32, %arg2: memref<1x128x320xbf16, #tpu.memory_space<vmem>>, %arg3: memref<320x128xbf16, #tpu.memory_space<vmem>>, %arg4: memref<1x128xf32, #tpu.memory_space<vmem>>, %arg5: memref<1x1x128xi32, #tpu.memory_space<vmem>>) attributes {dimension_semantics = [#tpu.dimension_semantics<parallel>, #tpu.dimension_semantics<parallel>], iteration_bounds = array<i64: 2, 1>, scalar_prefetch = 0 : i64, scratch_operands = 0 : i64, tpu.core_type = #tpu.core_type<tc>, window_params = [{transform_indices = @transform_0, window_bounds = array<i64: 1, 128, 320>}, {pipeline_mode = #tpu.pipeline_mode<synchronous>, transform_indices = @transform_1, window_bounds = array<i64: 320, 128>}, {pipeline_mode = #tpu.pipeline_mode<synchronous>, transform_indices = @transform_2, window_bounds = array<i64: 1, 128>}, {transform_indices = @transform_3, window_bounds = array<i64: 1, 1, 128>}]} {
    %c0 = arith.constant 0 : index
    %c0_0 = arith.constant 0 : index
    %c0_1 = arith.constant 0 : index
    %0 = vector.load %arg2[%c0, %c0_0, %c0_1] : memref<1x128x320xbf16, #tpu.memory_space<vmem>>, vector<1x128x320xbf16>
    %1 = vector.shape_cast %0 : vector<1x128x320xbf16> to vector<128x320xbf16>
    %c0_2 = arith.constant 0 : index
    %c0_3 = arith.constant 0 : index
    %2 = vector.load %arg3[%c0_2, %c0_3] : memref<320x128xbf16, #tpu.memory_space<vmem>>, vector<320x128xbf16>
    %cst = arith.constant dense<0.000000e+00> : vector<128x128xf32>
    %3 = tpu.matmul %1, %2, %cst {dimension_numbers = #tpu.dot_dimension_numbers<[1], [0], [0], [1], [0, 0, 1, 1], [], []>} : vector<128x320xbf16>, vector<320x128xbf16>, vector<128x128xf32> -> vector<128x128xf32>
    %c0_4 = arith.constant 0 : index
    %c0_5 = arith.constant 0 : index
    %4 = vector.load %arg4[%c0_4, %c0_5] : memref<1x128xf32, #tpu.memory_space<vmem>>, vector<1x128xf32>
    %cst_6 = arith.constant 2.000000e+00 : f32
    %5 = vector.broadcast %cst_6 : f32 to vector<128x128xf32>
    %6 = arith.mulf %5, %3 : vector<128x128xf32>
    %7 = vector.broadcast %4 : vector<1x128xf32> to vector<128x128xf32>
    %8 = arith.subf %7, %6 : vector<128x128xf32>
    %cst_7 = arith.constant dense<0x7F800000> : vector<128xf32>
    %9 = vector.multi_reduction <minimumf>, %8, %cst_7 [1] : vector<128x128xf32> to vector<128xf32>
    %10 = vector.shape_cast %9 : vector<128xf32> to vector<128x1xf32>
    %11 = tpu.iota {dimensions = array<i32: 1>} : vector<128x128xi32>
    %12 = vector.broadcast %10 : vector<128x1xf32> to vector<128x128xf32>
    %13 = arith.cmpf oeq, %8, %12 : vector<128x128xf32>
    %c128_i32 = arith.constant 128 : i32
    %14 = vector.broadcast %c128_i32 : i32 to vector<128x128xi32>
    %15 = arith.select %13, %11, %14 : vector<128x128xi1>, vector<128x128xi32>
    %cst_8 = arith.constant dense<2147483647> : vector<128xi32>
    %16 = vector.multi_reduction <minsi>, %15, %cst_8 [1] : vector<128x128xi32> to vector<128xi32>
    %17 = vector.shape_cast %16 : vector<128xi32> to vector<1x1x128xi32>
    %c0_9 = arith.constant 0 : index
    %c0_10 = arith.constant 0 : index
    %c0_11 = arith.constant 0 : index
    %18 = vector.load %arg5[%c0_9, %c0_10, %c0_11] : memref<1x1x128xi32, #tpu.memory_space<vmem>>, vector<1x1x128xi32>
    tpu.vector_store %arg5[%c0_9, %c0_10, %c0_11], %17 {strides = array<i32>} : memref<1x1x128xi32, #tpu.memory_space<vmem>>, vector<1x1x128xi32>,
    return
  }
  func.func @transform_0(%arg0: i32, %arg1: i32) -> (i32, i32, i32) {
    %c0_i32 = arith.constant 0 : i32
    %c0_i32_0 = arith.constant 0 : i32
    return %arg0, %arg1, %c0_i32 : i32, i32, i32
  }
  func.func @transform_1(%arg0: i32, %arg1: i32) -> (i32, i32) {
    %c0_i32 = arith.constant 0 : i32
    %c0_i32_0 = arith.constant 0 : i32
    %c0_i32_1 = arith.constant 0 : i32
    return %c0_i32, %c0_i32_0 : i32, i32
  }
  func.func @transform_2(%arg0: i32, %arg1: i32) -> (i32, i32) {
    %c0_i32 = arith.constant 0 : i32
    %c0_i32_0 = arith.constant 0 : i32
    %c0_i32_1 = arith.constant 0 : i32
    return %c0_i32, %c0_i32_0 : i32, i32
  }
  func.func @transform_3(%arg0: i32, %arg1: i32) -> (i32, i32, i32) {
    %c0_i32 = arith.constant 0 : i32
    %c0_i32_0 = arith.constant 0 : i32
    return %arg0, %c0_i32, %arg1 : i32, i32, i32
  }
}

</mosaic_0001>

<bundles_post_ra>
// kernel: tpu_custom_call.1
= control target key start
LH: loop header
LB: loop body
LE: loop exit
PB: predicated region body
PF: predicated region fallthrough
CT: control target
= control target key end

     0   :  { %8 = vsyncpa [#allocation3], 0  ;;  %s2205_s0 = inlined_call_operand.vmem [shape: bf16[2,128,320], index: 0, kind: input, shape index: {}]   ;;  %s2206_s1 = inlined_call_operand.vmem [shape: bf16[320,128], index: 1, kind: input, shape index: {}]   ;;  %s2207_s2 = inlined_call_operand.vmem [shape: f32[1,128], index: 2, kind: input, shape index: {}]   ;;  %s2208_s3 = inlined_call_operand.hbm [shape: s32[2,1,128], index: 3, kind: output, shape index: {}]  }
   0x1   :  { %10 = vsyncpa [#allocation3 + $0x1], 0  ;;  %s1646_s12 = smov 0   ;;  %s1648_s13 = smov 0  }
   0x2   :  { %s1650_s14 = smov 0   ;;  %s1652_s15 = smov 0  }
   0x3   :  { %s1654_s16 = smov 0   ;;  %s1656_s17 = smov 0  }
   0x4 LB: > { %s1259_s18 = sadd.s32 4294967295, %s1623_s17   ;;  %s1260_s19 = sadd.s32 4294967294, %s1623_s17   ;;  %s1623_s17 = sphi %s1656_s17, %s16_s17   ;;  %s1619_s16 = sphi %s1654_s16, %s2215_s16   ;;  %s1615_s15 = sphi %s1652_s15, %s2214_s15   ;;  %s1611_s14 = sphi %s1650_s14, %s2213_s14   ;;  %s1607_s13 = sphi %s1648_s13, %s2212_s13   ;;  %s1603_s12 = sphi %s1646_s12, %s2211_s12  }
   0x5   : > { %s28_s20 = sadd.s32 1, %s1619_s16  ;;  %s107_s21 = sadd.s32 1, %s1611_s14 }
   0x6   : > { %p30_p0 = scmp.ge.s32.totalorder %s28_s20, 2  ;;  %p117_p1 = scmp.ne.s32.totalorder %s1611_s14, %s1607_s13 }
   0x7   : > { %p118_p2 = scmp.eq.s32.totalorder %s1259_s18, 1  ;;  %p123_p3 = scmp.ne.s32.totalorder %s1607_s13, %s1603_s12 }
   0x8   : > { %s2217_s20 = smov (%p30_p0, %s28_s20), 0  ;;  %p124_p5 = scmp.eq.s32.totalorder %s1260_s19, 1 }
   0x9   : > { %p1686_p4 = por %p118_p2, %p117_p1  ;;  %s102_s23 = ssub.s32 %s1619_s16, %s2217_s20 }
   0xa   : > { %p1263_p6 = scmp.ge.s32.totalorder %s1623_s17, 1  ;;  %p105_p7 = scmp.eq.s32.totalorder %s102_s23, 0 }
   0xb   : > { %p1693_p8 = por %p124_p5, %p123_p3  ;;  %p162_p9 = scmp.lt.s32.totalorder %s1623_s17, 3 }
   0xc   : > { %s1699_s25 = scalar_select %p105_p7, %s1611_s14, %s107_s21  }
   0xd   : > { %p163_p10 = pnand %p1263_p6, %p162_p9 }
   0xe   : > { %v1493_v0 = vld [vmem:[%s2206_s1 + $0x40] sm:$0xff] (!%p163_p10)   ;;  %v1495_v2 = vld [vmem:[%s2206_s1 + $0x48] sm:$0xff] (!%p163_p10)   ;;  %p191_p11 = scmp.lt.s32.totalorder (!%p163_p10), %s1615_s15, 1  ;;  %v1497_v4 = vld [vmem:[%s2206_s1 + $0x50] sm:$0xff] (!%p163_p10)   ;;  %vm514_vm0 = vcmask (!%p163_p10), 523264   ;;  %s188_s18 = sand.u32 (!%p163_p10), 1, %s1607_s13  }
   0xf   : > { %166 = sbr.rel (%p163_p10) target bundleno = 771 (0x303), region = 32  ;;  %v1494_v1 = vld [vmem:[%s2206_s1] sm:$0xff] (!%p163_p10)   ;;  %1321 = vmatprep.subr.bf16.mxu0 (!%p163_p10), %v1493_v0  ;;  %1421 = vmatprep.subr.bf16.mxu1 (!%p163_p10), %v1493_v0  ;;  %v1496_v3 = vld [vmem:[%s2206_s1 + $0x8] sm:$0xff] (!%p163_p10)   ;;  %v1498_v5 = vld [vmem:[%s2206_s1 + $0x10] sm:$0xff] (!%p163_p10)   ;;  %s1318_s19 = sshll.u32 (!%p163_p10), %s1615_s15, 4 }
  0x10   : > { %1322 = vmatpush3.bf16.msra.mxu0 (!%p163_p10), %v1494_v1  ;;  %1429 = vmatpush3.bf16.msra.mxu1 (!%p163_p10), %v1494_v1  ;;  %v1499_v6 = vld [vmem:[%s2206_s1 + $0x58] sm:$0xff] (!%p163_p10)   ;;  %v1501_v8 = vld [vmem:[%s2206_s1 + $0x60] sm:$0xff] (!%p163_p10)   ;;  %v1503_v10 = vld [vmem:[%s2206_s1 + $0x68] sm:$0xff] (!%p163_p10)   ;;  %s2156_s28 = scalar_lea.hbm (!%p163_p10), %s2208_s3, %s1318_s19  ;;  %s1625_s30 = smov (!%p163_p10), [#allocation2]  }
  0x11   : > { %1323 = vmatprep.subr.bf16.mxu0 (!%p163_p10), %v1495_v2  ;;  %1422 = vmatprep.subr.bf16.mxu1 (!%p163_p10), %v1495_v2  ;;  %v1500_v7 = vld [vmem:[%s2206_s1 + $0x18] sm:$0xff] (!%p163_p10)   ;;  %v1502_v9 = vld [vmem:[%s2206_s1 + $0x20] sm:$0xff] (!%p163_p10)   ;;  %v1504_v13 = vld [vmem:[%s2206_s1 + $0x28] sm:$0xff] (!%p163_p10)   ;;  %s1549_s5 = sshll.u32 (!%p163_p10), %s1625_s30, 4  ;;  %s1550_s5 = int_to_ptr.vmem [resolvable:$false] %s1549_s5 }
  0x12   : > { %v1505_v14 = vld [vmem:[%s2206_s1 + $0x70] sm:$0xff] (!%p163_p10)   ;;  %v1507_v16 = vld [vmem:[%s2206_s1 + $0x78] sm:$0xff] (!%p163_p10)   ;;  %v1515_v18 = vld [vmem:[%s2206_s1 + $0x80] sm:$0xff] (!%p163_p10)   ;;  %s1551_s6 = scalar_lea.vmem (!%p163_p10), %s1550_s5, 32 }
  0x13   : > { %v1506_v15 = vld [vmem:[%s2206_s1 + $0x30] sm:$0xff] (!%p163_p10)   ;;  %v1508_v17 = vld [vmem:[%s2206_s1 + $0x38] sm:$0xff] (!%p163_p10)   ;;  %v1516_v21 = vld [vmem:[%s2206_s1 + $0x88] sm:$0xff] (!%p163_p10)  }
  0x14   : > { %1324 = vmatpush3.bf16.msra.mxu0 (!%p163_p10), %v1496_v3  ;;  %1430 = vmatpush3.bf16.msra.mxu1 (!%p163_p10), %v1496_v3  ;;  %v1523_v24 = vld [vmem:[%s2206_s1 + $0x90] sm:$0xff] (!%p163_p10)   ;;  %v1524_v28 = vld [vmem:[%s2206_s1 + $0x98] sm:$0xff] (!%p163_p10)  }
  0x15   : > { %1325 = vmatprep.subr.bf16.mxu0 (!%p163_p10), %v1497_v4  ;;  %1423 = vmatprep.subr.bf16.mxu1 (!%p163_p10), %v1497_v4 }
  0x16   : > { %s192_s9 = scalar_select %p191_p11, %s1615_s15, 1 }
  0x17   : > { %s1173_s15 = scalar_lea.sflag [#allocation3], %s188_s18 }
  0x18   : > { %s1437_s21 = smul.u32 192, %s192_s9  ;;  %1326 = vmatpush3.bf16.msra.mxu0 %v1498_v5  ;;  %1431 = vmatpush3.bf16.msra.mxu1 %v1498_v5 }
  0x19   : > { %1327 = vmatprep.subr.bf16.mxu0 %v1499_v6  ;;  %1424 = vmatprep.subr.bf16.mxu1 %v1499_v6 }
  0x1a   : > { %s1733_s4 = scalar_lea.vmem %s2205_s0, %s1437_s21  ;;  %s189_s21 = scalar_lea.vmem [#allocation2], %s188_s18 }
  0x1b   : > { %v1511_v11 = vld [vmem:[%s1733_s4 + $0x4] ss:$12 sps:$4 sm:$0xff]   ;;  %v1514_v12 = vld [vmem:[%s1733_s4 + $0x94] ss:$12 sps:$4 sm:$0xff]   ;;  %v1517_v22 = vld [vmem:[%s1733_s4 + $0x1c] ss:$12 sps:$4 sm:$0xff]  }
  0x1c   : > { %1328 = vmatpush3.bf16.msra.mxu0 %v1500_v7  ;;  %1432 = vmatpush3.bf16.msra.mxu1 %v1500_v7  ;;  %v1509_v19 = vld [vmem:[%s1733_s4] ss:$12 sps:$4 sm:$0xff]   ;;  %v1512_v20 = vld [vmem:[%s1733_s4 + $0x90] ss:$12 sps:$4 sm:$0xff]   ;;  %v1521_v25 = vld [vmem:[%s1733_s4 + $0x18] ss:$12 sps:$4 sm:$0xff]  }
  0x1d   : > { %1329 = vmatprep.subr.bf16.mxu0 %v1501_v8  ;;  %1425 = vmatprep.subr.bf16.mxu1 %v1501_v8  ;;  %v1519_v23 = vld [vmem:[%s1733_s4 + $0xac] ss:$12 sps:$4 sm:$0xff]   ;;  %v1522_v26 = vld [vmem:[%s1733_s4 + $0xa8] ss:$12 sps:$4 sm:$0xff]   ;;  %v1528_v30 = vld [vmem:[%s1733_s4 + $0x30] ss:$12 sps:$4 sm:$0xff]  }
  0x1e   : > { %571 = vmatprep.mubr.bf16.mxu0 %v1511_v11  ;;  %619 = vmatprep.mubr.bf16.mxu1 %v1514_v12  ;;  %v1525_v27 = vld [vmem:[%s1733_s4 + $0x34] ss:$12 sps:$4 sm:$0xff]   ;;  %v1530_v32 = vld [vmem:[%s1733_s4 + $0x4c] ss:$12 sps:$4 sm:$0xff]   ;;  %v1534_v35 = vld [vmem:[%s1733_s4 + $0x50] ss:$12 sps:$4 sm:$0xff]  }
  0x1f   : > { %v1527_v29 = vld [vmem:[%s1733_s4 + $0x8] ss:$12 sps:$4 sm:$0xff]   ;;  %v1529_v31 = vld [vmem:[%s1733_s4 + $0x20] ss:$12 sps:$4 sm:$0xff]   ;;  %v1532_v33 = vld [vmem:[%s1733_s4 + $0x38] ss:$12 sps:$4 sm:$0xff]  }
  0x20   : > { %1330 = vmatpush3.bf16.msra.mxu0 %v1502_v9  ;;  %1433 = vmatpush3.bf16.msra.mxu1 %v1502_v9  ;;  %v1533_v34 = vld [vmem:[%s1733_s4 + $0x48] ss:$12 sps:$4 sm:$0xff]   ;;  %v1535_v36 = vld [vmem:[%s1733_s4 + $0x64] ss:$12 sps:$4 sm:$0xff]   ;;  %v1538_v38 = vld [vmem:[%s1733_s4 + $0x60] ss:$12 sps:$4 sm:$0xff]  }
  0x21   : > { %1331 = vmatprep.subr.bf16.mxu0 %v1503_v10  ;;  %1426 = vmatprep.subr.bf16.mxu1 %v1503_v10  ;;  %v1537_v37 = vld [vmem:[%s1733_s4 + $0x68] ss:$12 sps:$4 sm:$0xff]   ;;  %v1539_v39 = vld [vmem:[%s1733_s4 + $0x80] ss:$12 sps:$4 sm:$0xff]   ;;  %v1542_v41 = vld [vmem:[%s1733_s4 + $0x98] ss:$12 sps:$4 sm:$0xff]  }
  0x22   : > { %v1540_v40 = vld [vmem:[%s1733_s4 + $0x7c] ss:$12 sps:$4 sm:$0xff]   ;;  %v1543_v42 = vld [vmem:[%s1733_s4 + $0x78] ss:$12 sps:$4 sm:$0xff]   ;;  %s1186_s23 = sshll.u32 %s189_s21, 4  ;;  %s2158_s23 = int_to_ptr.vmem [resolvable:$true] %s1186_s23 }
  0x23   : > { %v1544_v43 = vld [vmem:[%s1733_s4 + $0xb0] ss:$12 sps:$4 sm:$0xff]   ;;  %s1545_s29 = scalar_lea.vmem %s2158_s23, 16  ;;  %p1552_p1 = scmp.lt.s32.totalorder %s2158_s23, %s1550_s5 }
  0x24   : > { %1332 = vmatpush3.bf16.msra.mxu0 %v1504_v13  ;;  %1434 = vmatpush3.bf16.msra.mxu1 %v1504_v13  ;;  %v1811_v13 = vld [vmem:[%s2207_s2] ss:$0 sm:$0xff]  ;;  %p1546_p12 = scmp.ne.s32.totalorder %s2158_s23, %s1545_s29  ;;  %p1553_p2 = scmp.lt.s32.totalorder %s1551_s6, %s1545_s29 }
  0x25   : > { %1333 = vmatprep.subr.bf16.mxu0 %v1505_v14  ;;  %1427 = vmatprep.subr.bf16.mxu1 %v1505_v14 }
  0x26   : > { %p1547_p13 = pnand %p1546_p12, %p1686_p4  ;;  %p1554_p3 = por %p1553_p2, %p1552_p1 }
  0x28   : > { %1334 = vmatpush3.bf16.msra.mxu0 %v1506_v15  ;;  %1435 = vmatpush3.bf16.msra.mxu1 %v1506_v15  ;;  %p1548_p0 = pneg %p1547_p13 }
  0x29   : > { %1335 = vmatprep.subr.bf16.mxu0 %v1507_v16  ;;  %1428 = vmatprep.subr.bf16.mxu1 %v1507_v16 }
  0x2a   : > { %p1555_p5 = pnand %p1554_p3, %p1548_p0 }
  0x2c   : > { %1336 = vmatpush3.bf16.msra.mxu0 %v1508_v17  ;;  %1436 = vmatpush3.bf16.msra.mxu1 %v1508_v17 }
  0x2d   : > { %1397 = vmatprep.subr.bf16.mxu1 %v1515_v18 }
  0x2f   : > { %572 = vmatmul.mubr.bf16.vlgmr.msra.gmra.mrb[0].mxu0 %v1509_v19  ;;  %620 = vmatmul.mubr.bf16.vlgmr.msra.gmra.mrb[0].mxu1 %v1512_v20 }
  0x30   : > { %1398 = vmatpush3.bf16.msra.mxu1 %v1515_v18  ;;  %579 = vmatprep.mubr.bf16.mxu0 %v1517_v22 }
  0x31   : > { %1399 = vmatprep.subr.bf16.mxu1 %v1516_v21  ;;  %627 = vmatprep.mubr.bf16.mxu1 %v1519_v23 }
  0x34   : > { %1400 = vmatpush3.bf16.msra.mxu1 %v1516_v21 }
  0x35   : > { %1401 = vmatprep.subr.bf16.mxu1 %v1523_v24 }
  0x37   : > { %580 = vmatmul.mubr.bf16.gmra.mrb[4].mxu0 %v1521_v25  ;;  %628 = vmatmul.mubr.bf16.gmra.mrb[4].mxu1 %v1522_v26 }
  0x38   : > { %1402 = vmatpush3.bf16.msra.mxu1 %v1523_v24  ;;  %587 = vmatprep.mubr.bf16.mxu0 %v1525_v27 }
  0x39   : > { %1403 = vmatprep.subr.bf16.mxu1 %v1524_v28  ;;  %1405 = vmatprep.mubr.msk.bf16.mxu1 %vm514_vm0, %v1527_v29 }
  0x3c   : > { %1404 = vmatpush3.bf16.msra.mxu1 %v1524_v28 }
  0x3f   : > { %588 = vmatmul.mubr.bf16.gmra.mrb[8].mxu0 %v1528_v30  ;;  %1406 = vmatmul.mubr.msk.bf16.vlgmr.msra.gmra.mrb[8].mxu1 %vm514_vm0, %v1529_v31 }
  0x40   : > { %595 = vmatprep.mubr.bf16.mxu0 %v1530_v32  ;;  %1409 = vmatprep.mubr.msk.bf16.mxu1 %vm514_vm0, %v1532_v33 }
  0x47   : > { %596 = vmatmul.mubr.bf16.gmra.mrb[12].mxu0 %v1533_v34  ;;  %1410 = vmatmul.mubr.msk.bf16.gmra.mrb[12].mxu1 %vm514_vm0, %v1534_v35 }
  0x48   : > { %603 = vmatprep.mubr.bf16.mxu0 %v1535_v36  ;;  %1413 = vmatprep.mubr.msk.bf16.mxu1 %vm514_vm0, %v1537_v37 }
  0x4f   : > { %604 = vmatmul.mubr.bf16.gmra.mrb[16].mxu0 %v1538_v38  ;;  %1414 = vmatmul.mubr.msk.bf16.gmra.mrb[16].mxu1 %vm514_vm0, %v1539_v39 }
  0x50   : > { %611 = vmatprep.mubr.bf16.mxu0 %v1540_v40  ;;  %1417 = vmatprep.mubr.msk.bf16.mxu1 %vm514_vm0, %v1542_v41 }
  0x57   : > { %612 = vmatmul.mubr.bf16.gmra.mrb[20].mxu0 %v1543_v42  ;;  %1418 = vmatmul.mubr.msk.bf16.gmra.mrb[20].mxu1 %vm514_vm0, %v1544_v43 }
 0x102   : > { %v1337_v44 = vpop.f32.mrb[0].mxu0  ;;  %v1373_v45 = vpop.f32.mrb[0].mxu1 }
 0x103   : > { %v1338_v46 = vpop.f32.mrb[1].mxu0  ;;  %v1374_v47 = vpop.f32.mrb[1].mxu1 }
 0x104   : > { %v1339_v48 = vadd.f32 %v1338_v46, %v1337_v44  ;;  %v1800_v49 = vadd.f32 %v1374_v47, %v1373_v45  ;;  %v1340_v50 = vpop.f32.mrb[2].mxu0  ;;  %v1376_v51 = vpop.f32.mrb[2].mxu1 }
 0x105   : > { %v1341_v52 = vpop.f32.mrb[3].mxu0  ;;  %v1377_v53 = vpop.f32.mrb[3].mxu1 }
 0x106   : > { %v1342_v54 = vadd.f32 %v1341_v52, %v1340_v50  ;;  %v1802_v55 = vadd.f32 %v1377_v53, %v1376_v51 }
 0x10a   : > { %v1343_v56 = vpop.f32.mrb[4].mxu0  ;;  %v1379_v57 = vpop.f32.mrb[4].mxu1 }
 0x10b   : > { %v1344_v58 = vpop.f32.mrb[5].mxu0  ;;  %v1380_v59 = vpop.f32.mrb[5].mxu1 }
 0x10c   : > { %v1345_v60 = vadd.f32 %v1344_v58, %v1343_v56  ;;  %v1804_v61 = vadd.f32 %v1380_v59, %v1379_v57  ;;  %v1346_v62 = vpop.f32.mrb[6].mxu0  ;;  %v1382_v63 = vpop.f32.mrb[6].mxu1 }
 0x10d   : > { %v1347_v0 = vpop.f32.mrb[7].mxu0  ;;  %v1383_v1 = vpop.f32.mrb[7].mxu1 }
 0x10e   : > { %v1348_v2 = vadd.f32 %v1347_v0, %v1346_v62  ;;  %v1806_v3 = vadd.f32 %v1383_v1, %v1382_v63 }
 0x112   : > { %v1349_v4 = vpop.f32.mrb[8].mxu0  ;;  %v1407_v5 = vpop.f32.mrb[8].mxu1 }
 0x113   : > { %v679_v6 = vadd.f32 %v1407_v5, %v1345_v60  ;;  %v1350_v7 = vpop.f32.mrb[9].mxu0  ;;  %v670_v8 = vpop.f32.mrb[9].mxu1 }
 0x114   : > { %v1351_v9 = vadd.f32 %v1350_v7, %v1349_v4  ;;  %v671_v10 = vadd.f32 %v1339_v48, %v670_v8  ;;  %v1352_v11 = vpop.f32.mrb[10].mxu0  ;;  %v1408_v12 = vpop.f32.mrb[10].mxu1 }
 0x115   : > { %v736_v14 = vmul.f32 2.0, %v679_v6  ;;  %v682_v15 = vadd.f32 %v1408_v12, %v1348_v2  ;;  %v1353_v16 = vpop.f32.mrb[11].mxu0  ;;  %v673_v17 = vpop.f32.mrb[11].mxu1 }
 0x116   : > { %v734_v18 = vmul.f32 2.0, %v671_v10  ;;  %v1354_v19 = vadd.f32 %v1353_v16, %v1352_v11  ;;  %v674_v20 = vadd.f32 %v1342_v54, %v673_v17 }
 0x117   : > { %v737_v21 = vmul.f32 2.0, %v682_v15  ;;  %v1814_v22 = vsub.f32 %v1811_v13, %v736_v14 }
 0x118   : > { %v735_v23 = vmul.f32 2.0, %v674_v20  ;;  %v1817_v24 = vsub.f32 %v1811_v13, %v734_v18 }
 0x119   : > { %776 = vmin.xlane.f32.xlu1 %v1814_v22  ;;  %v1822_v29 = vsub.f32 %v1811_v13, %v737_v21 }
 0x11a   : > { %v1355_v25 = vpop.f32.mrb[12].mxu0  ;;  %v1411_v26 = vpop.f32.mrb[12].mxu1  ;;  %772 = vmin.xlane.f32.xlu0 %v1817_v24  ;;  %v1825_v34 = vsub.f32 %v1811_v13, %v735_v23 }
 0x11b   : > { %v1356_v27 = vpop.f32.mrb[13].mxu0  ;;  %v686_v28 = vpop.f32.mrb[13].mxu1 }
 0x11c   : > { %v1357_v30 = vadd.f32 %v1356_v27, %v1355_v25  ;;  %v687_v31 = vadd.f32 %v1351_v9, %v686_v28  ;;  %v1358_v32 = vpop.f32.mrb[14].mxu0  ;;  %v1412_v33 = vpop.f32.mrb[14].mxu1 }
 0x11d   : > { %v1359_v35 = vpop.f32.mrb[15].mxu0  ;;  %v689_v36 = vpop.f32.mrb[15].mxu1  ;;  %778 = vmin.xlane.f32.xlu1 %v1822_v29 }
 0x11e   : > { %v695_v37 = vadd.f32 %v1411_v26, %v1357_v30  ;;  %v738_v38 = vmul.f32 2.0, %v687_v31  ;;  %v1360_v39 = vadd.f32 %v1359_v35, %v1358_v32  ;;  %v690_v40 = vadd.f32 %v1354_v19, %v689_v36  ;;  %774 = vmin.xlane.f32.xlu0 %v1825_v34 }
 0x120   : > { %v740_v41 = vmul.f32 2.0, %v695_v37  ;;  %v698_v42 = vadd.f32 %v1412_v33, %v1360_v39  ;;  %v739_v43 = vmul.f32 2.0, %v690_v40  ;;  %v1830_v44 = vsub.f32 %v1811_v13, %v738_v38 }
 0x121   : > { %v804_v33 = vlaneseq }
 0x122   : > { %v741_v45 = vmul.f32 2.0, %v698_v42  ;;  %v1361_v46 = vpop.f32.mrb[16].mxu0  ;;  %v1415_v47 = vpop.f32.mrb[16].mxu1  ;;  %780 = vmin.xlane.f32.xlu0 %v1830_v44  ;;  %v1834_v48 = vsub.f32 %v1811_v13, %v739_v43  ;;  %v1838_v56 = vsub.f32 %v1811_v13, %v740_v41 }
 0x123   : > { %v1362_v50 = vpop.f32.mrb[17].mxu0  ;;  %v702_v51 = vpop.f32.mrb[17].mxu1  ;;  %v1882_v35 = vand.u32 127, %v804_v33 }
 0x124   : > { %v1363_v52 = vadd.f32 %v1362_v50, %v1361_v46  ;;  %v1364_v53 = vpop.f32.mrb[18].mxu0  ;;  %v1416_v54 = vpop.f32.mrb[18].mxu1  ;;  %782 = vmin.xlane.f32.xlu1 %v1834_v48  ;;  %v1842_v62 = vsub.f32 %v1811_v13, %v741_v45 }
 0x125   : > { %v1365_v57 = vpop.f32.mrb[19].mxu0  ;;  %v705_v58 = vpop.f32.mrb[19].mxu1 }
 0x126   : > { %v703_v59 = vadd.f32 %v1363_v52, %v702_v51  ;;  %v1366_v60 = vadd.f32 %v1365_v57, %v1364_v53  ;;  %784 = vmin.xlane.f32.xlu0 %v1838_v56 }
 0x128   : > { %v742_v63 = vmul.f32 2.0, %v703_v59  ;;  %v706_v0 = vadd.f32 %v1366_v60, %v705_v58  ;;  %786 = vmin.xlane.f32.xlu1 %v1842_v62 }
 0x12a   : > { %v743_v1 = vmul.f32 2.0, %v706_v0  ;;  %v1367_v2 = vpop.f32.mrb[20].mxu0  ;;  %v1419_v4 = vpop.f32.mrb[20].mxu1  ;;  %v1846_v5 = vsub.f32 %v1811_v13, %v742_v63 }
 0x12b   : > { %v727_v6 = vadd.f32 %v1419_v4, %v1804_v61  ;;  %v1368_v7 = vpop.f32.mrb[21].mxu0  ;;  %v718_v8 = vpop.f32.mrb[21].mxu1 }
 0x12c   : > { %v1369_v9 = vadd.f32 %v1368_v7, %v1367_v2  ;;  %v719_v10 = vadd.f32 %v1800_v49, %v718_v8  ;;  %v1370_v11 = vpop.f32.mrb[22].mxu0  ;;  %v1420_v12 = vpop.f32.mrb[22].mxu1  ;;  %788 = vmin.xlane.f32.xlu0 %v1846_v5  ;;  %v1852_v14 = vsub.f32 %v1811_v13, %v743_v1 }
 0x12d   : > { %v730_v15 = vadd.f32 %v1420_v12, %v1806_v3  ;;  %v1371_v16 = vpop.f32.mrb[23].mxu0  ;;  %v721_v17 = vpop.f32.mrb[23].mxu1  ;;  %v748_v27 = vmul.f32 2.0, %v727_v6 }
 0x12e   : > { %v711_v18 = vadd.f32 %v1415_v47, %v1369_v9  ;;  %v746_v19 = vmul.f32 2.0, %v719_v10  ;;  %v1372_v20 = vadd.f32 %v1371_v16, %v1370_v11  ;;  %v722_v61 = vadd.f32 %v1802_v55, %v721_v17  ;;  %790 = vmin.xlane.f32.xlu1 %v1852_v14 }
 0x12f   : > { %v749_v55 = vmul.f32 2.0, %v730_v15  ;;  %v1874_v31 = vsub.f32 %v1811_v13, %v748_v27 }
 0x130   : > { %v744_v21 = vmul.f32 2.0, %v711_v18  ;;  %v714_v49 = vadd.f32 %v1416_v54, %v1372_v20  ;;  %v747_v23 = vmul.f32 2.0, %v722_v61  ;;  %v1858_v25 = vsub.f32 %v1811_v13, %v746_v19 }
 0x131   : > { %v1878_v32 = vsub.f32 %v1811_v13, %v749_v55 }
 0x132   : > { %v745_v26 = vmul.f32 2.0, %v714_v49  ;;  %796 = vmin.xlane.f32.xlu0 %v1858_v25  ;;  %v1862_v3 = vsub.f32 %v1811_v13, %v747_v23  ;;  %v1866_v28 = vsub.f32 %v1811_v13, %v744_v21 }
 0x134   : > { %798 = vmin.xlane.f32.xlu1 %v1862_v3  ;;  %v1870_v30 = vsub.f32 %v1811_v13, %v745_v26 }
 0x136   : > { %792 = vmin.xlane.f32.xlu0 %v1866_v28 }
 0x138   : > { %794 = vmin.xlane.f32.xlu1 %v1870_v30 }
 0x13a   : > { %800 = vmin.xlane.f32.xlu0 %v1874_v31 }
 0x13c   : > { %802 = vmin.xlane.f32.xlu1 %v1878_v32 }
 0x1a6   : > { %v777_v36 = vpop.xlane.xlu1 %776 }
 0x1a7   : > { %vm808_vm1 = vcmp.eq.f32.partialorder %v1814_v22, %v777_v36  ;;  %v773_v37 = vpop.xlane.xlu0 %772 }
 0x1a8   : > { %v1886_v38 = vsel %vm808_vm1, %v1882_v35, 128  ;;  %vm806_vm2 = vcmp.eq.f32.partialorder %v1817_v24, %v773_v37 }
 0x1a9   : > { %v1890_v39 = vsel %vm806_vm2, %v1882_v35, 128  ;;  %v867_v13 = vshra.s32 %v1886_v38, 16 }
 0x1aa   : > { %v779_v40 = vpop.xlane.xlu1 %778  ;;  %v839_v43 = vshra.s32 %v1890_v39, 16 }
 0x1ab   : > { %vm809_vm3 = vcmp.eq.f32.partialorder %v1822_v29, %v779_v40  ;;  %v775_v41 = vpop.xlane.xlu0 %774  ;;  %v1894_v42 = vcvt.s32.f32 %v867_v13  ;;  %v838_v40 = vand.u32 65535, %v1890_v39 }
 0x1ac   : > { %v1898_v22 = vsel %vm809_vm3, %v1882_v35, 128  ;;  %vm807_vm4 = vcmp.eq.f32.partialorder %v1825_v34, %v775_v41  ;;  %v1908_v29 = vcvt.s32.f32 %v839_v43 }
 0x1ad   : > { %v1902_v24 = vsel %vm807_vm4, %v1882_v35, 128  ;;  %870 = vmin.xlane.f32.xlu0 %v1894_v42  ;;  %v881_v45 = vshra.s32 %v1898_v22, 16  ;;  %v880_v41 = vand.u32 65535, %v1898_v22 }
 0x1ae   : > { %v853_v50 = vshra.s32 %v1902_v24, 16 }
 0x1af   : > { %v781_v46 = vpop.xlane.xlu0 %780  ;;  %v1906_v47 = vcvt.s32.f32 %v881_v45 }
 0x1b0   : > { %vm810_vm5 = vcmp.eq.f32.partialorder %v1830_v44, %v781_v46  ;;  %v1922_v57 = vcvt.s32.f32 %v853_v50  ;;  %v852_v50 = vand.u32 65535, %v1902_v24 }
 0x1b1   : > { %v1913_v51 = vsel %vm810_vm5, %v1882_v35, 128  ;;  %884 = vmin.xlane.f32.xlu1 %v1906_v47  ;;  %v783_v34 = vpop.xlane.xlu1 %782  ;;  %842 = vmin.xlane.f32.xlu0 %v1908_v29 }
 0x1b2   : > { %vm811_vm6 = vcmp.eq.f32.partialorder %v1834_v48, %v783_v34  ;;  %v895_v52 = vshra.s32 %v1913_v51, 16  ;;  %v894_v39 = vand.u32 65535, %v1913_v51 }
 0x1b3   : > { %v1920_v53 = vsel %vm811_vm6, %v1882_v35, 128  ;;  %v785_v54 = vpop.xlane.xlu0 %784 }
 0x1b4   : > { %vm812_vm7 = vcmp.eq.f32.partialorder %v1838_v56, %v785_v54  ;;  %v1925_v44 = vcvt.s32.f32 %v895_v52  ;;  %v909_v58 = vshra.s32 %v1920_v53, 16  ;;  %v882_v54 = vcvt.s32.f32 %v880_v41 }
 0x1b5   : > { %v1929_v59 = vsel %vm812_vm7, %v1882_v35, 128  ;;  %v787_v60 = vpop.xlane.xlu1 %786  ;;  %856 = vmin.xlane.f32.xlu1 %v1922_v57  ;;  %v908_v24 = vand.u32 65535, %v1920_v53 }
 0x1b6   : > { %vm813_vm8 = vcmp.eq.f32.partialorder %v1842_v62, %v787_v60  ;;  %898 = vmin.xlane.f32.xlu0 %v1925_v44  ;;  %v1934_v48 = vcvt.s32.f32 %v909_v58  ;;  %v923_v63 = vshra.s32 %v1929_v59, 16  ;;  %v854_v60 = vcvt.s32.f32 %v852_v50 }
 0x1b7   : > { %v1938_v56 = vsel %vm813_vm8, %v1882_v35, 128  ;;  %v1073_v50 = vadd.s32 4294967280, %v1882_v35 }
 0x1b8   : > { %v1940_v0 = vcvt.s32.f32 %v923_v63  ;;  %v937_v1 = vshra.s32 %v1938_v56, 16  ;;  %v922_v63 = vand.u32 65535, %v1929_v59 }
 0x1b9   : > { %912 = vmin.xlane.f32.xlu1 %v1934_v48  ;;  %v789_v2 = vpop.xlane.xlu0 %788 }
 0x1ba   : > { %vm814_vm9 = vcmp.eq.f32.partialorder %v1846_v5, %v789_v2  ;;  %926 = vmin.xlane.f32.xlu0 %v1940_v0  ;;  %v1946_v62 = vcvt.s32.f32 %v937_v1  ;;  %v936_v2 = vand.u32 65535, %v1938_v56  ;;  %v924_v59 = vcvt.s32.f32 %v922_v63 }
 0x1bb   : > { %v1949_v4 = vsel %vm814_vm9, %v1882_v35, 128  ;;  %v791_v6 = vpop.xlane.xlu1 %790  ;;  %v1080_v63 = vadd.s32 4294967272, %v1882_v35 }
 0x1bc   : > { %vm815_vm10 = vcmp.eq.f32.partialorder %v1852_v14, %v791_v6  ;;  %v951_v7 = vshra.s32 %v1949_v4, 16  ;;  %v910_v6 = vcvt.s32.f32 %v908_v24  ;;  %v938_v56 = vcvt.s32.f32 %v936_v2 }
 0x1bd   : > { %v1954_v8 = vsel %vm815_vm10, %v1882_v35, 128  ;;  %940 = vmin.xlane.f32.xlu1 %v1946_v62 }
 0x1be   : > { %v1957_v9 = vcvt.s32.f32 %v951_v7  ;;  %v965_v5 = vshra.s32 %v1954_v8, 16 }
 0x1bf   : > { %v797_v10 = vpop.xlane.xlu0 %796 }
 0x1c0   : > { %vm818_vm11 = vcmp.eq.f32.partialorder %v1858_v25, %v797_v10  ;;  %954 = vmin.xlane.f32.xlu0 %v1957_v9  ;;  %v1962_v11 = vcvt.s32.f32 %v965_v5 }
 0x1c1   : > { %v1965_v12 = vsel %vm818_vm11, %v1882_v35, 128  ;;  %v799_v14 = vpop.xlane.xlu1 %798 }
 0x1c2   : > { %vm819_vm12 = vcmp.eq.f32.partialorder %v1862_v3, %v799_v14  ;;  %968 = vmin.xlane.f32.xlu1 %v1962_v11  ;;  %v1007_v15 = vshra.s32 %v1965_v12, 16  ;;  %v964_v14 = vand.u32 65535, %v1954_v8 }
 0x1c3   : > { %v1971_v16 = vsel %vm819_vm12, %v1882_v35, 128  ;;  %v793_v17 = vpop.xlane.xlu0 %792 }
 0x1c4   : > { %vm816_vm13 = vcmp.eq.f32.partialorder %v1866_v28, %v793_v17  ;;  %v1974_v18 = vcvt.s32.f32 %v1007_v15  ;;  %v1021_v19 = vshra.s32 %v1971_v16, 16 }
 0x1c5   : > { %v1978_v20 = vsel %vm816_vm13, %v1882_v35, 128  ;;  %v795_v61 = vpop.xlane.xlu1 %794 }
 0x1c6   : > { %vm817_vm14 = vcmp.eq.f32.partialorder %v1870_v30, %v795_v61  ;;  %1010 = vmin.xlane.f32.xlu0 %v1974_v18  ;;  %v1982_v21 = vcvt.s32.f32 %v1021_v19  ;;  %v979_v49 = vshra.s32 %v1978_v20, 16  ;;  %v966_v61 = vcvt.s32.f32 %v964_v14 }
 0x1c7   : > { %v1986_v23 = vsel %vm817_vm14, %v1882_v35, 128  ;;  %v801_v25 = vpop.xlane.xlu0 %800  ;;  %v1094_v14 = vadd.s32 4294967256, %v1882_v35 }
 0x1c8   : > { %vm820_vm15 = vcmp.eq.f32.partialorder %v1874_v31, %v801_v25  ;;  %1024 = vmin.xlane.f32.xlu1 %v1982_v21  ;;  %v1990_v26 = vcvt.s32.f32 %v979_v49  ;;  %v993_v3 = vshra.s32 %v1986_v23, 16  ;;  %v978_v49 = vand.u32 65535, %v1978_v20 }
 0x1c9   : > { %v1994_v27 = vsel %vm820_vm15, %v1882_v35, 128  ;;  %v803_v28 = vpop.xlane.xlu1 %802 }
 0x1ca   : > { %vm821_vm0 = vcmp.eq.f32.partialorder %v1878_v32, %v803_v28  ;;  %982 = vmin.xlane.f32.xlu0 %v1990_v26  ;;  %v1998_v55 = vcvt.s32.f32 %v993_v3  ;;  %v1035_v30 = vshra.s32 %v1994_v27, 16  ;;  %v866_v32 = vand.u32 65535, %v1886_v38 }
 0x1cb   : > { %v2002_v31 = vsel %vm821_vm0, %v1882_v35, 128  ;;  %v840_v38 = vcvt.s32.f32 %v838_v40 }
 0x1cc   : > { %996 = vmin.xlane.f32.xlu1 %v1998_v55  ;;  %v2005_v36 = vcvt.s32.f32 %v1035_v30  ;;  %v1049_v37 = vshra.s32 %v2002_v31, 16  ;;  %v868_v45 = vcvt.s32.f32 %v866_v32 }
 0x1ce   : > { %1038 = vmin.xlane.f32.xlu0 %v2005_v36  ;;  %v2009_v13 = vcvt.s32.f32 %v1049_v37  ;;  %v980_v37 = vcvt.s32.f32 %v978_v49  ;;  %v1101_v49 = vadd.s32 4294967248, %v1882_v35 }
 0x1d0   : > { %1052 = vmin.xlane.f32.xlu1 %v2009_v13 }
 0x23a   : > { %v2015_v43 = vpop.xlane.xlu0 %870 }
 0x23b   : > { %vm872_vm1 = vcmp.eq.f32.partialorder %v1894_v42, %v2015_v43 }
 0x23c   : > { %v873_v46 = vsel %vm872_vm1, %v868_v45, inf  ;;  %vm1071_vm1 = vcmask 130112  }
 0x23d   : > { %874 = vmin.xlane.f32.xlu0 %v873_v46 }
 0x23e   : > { %v2020_v34 = vpop.xlane.xlu1 %884  ;;  %v2022_v52 = vpop.xlane.xlu0 %842 }
 0x23f   : > { %vm886_vm2 = vcmp.eq.f32.partialorder %v1906_v47, %v2020_v34  ;;  %vm844_vm3 = vcmp.eq.f32.partialorder %v1908_v29, %v2022_v52  ;;  %v896_v47 = vcvt.s32.f32 %v894_v39  ;;  %v849_v39 = vcvt.f32.s32 %v2022_v52 }
 0x240   : > { %v887_v22 = vsel %vm886_vm2, %v882_v54, inf  ;;  %v845_v42 = vsel %vm844_vm3, %v840_v38, inf  ;;  %v877_v38 = vcvt.f32.s32 %v2015_v43  ;;  %v1066_v52 = vadd.s32 4294967288, %v1882_v35 }
 0x241   : > { %888 = vmin.xlane.f32.xlu1 %v887_v22  ;;  %846 = vmin.xlane.f32.xlu0 %v845_v42  ;;  %vm1078_vm2 = vcmask 195712   ;;  %vm1085_vm3 = vcmask 261312  }
 0x242   : > { %v2030_v58 = vpop.xlane.xlu1 %856 }
 0x243   : > { %v2033_v1 = vpop.xlane.xlu0 %898  ;;  %vm858_vm4 = vcmp.eq.f32.partialorder %v1922_v57, %v2030_v58  ;;  %v863_v22 = vcvt.f32.s32 %v2030_v58  ;;  %v850_v58 = vshll.u32 %v849_v39, 16 }
 0x244   : > { %v859_v51 = vsel %vm858_vm4, %v854_v60, inf  ;;  %vm900_vm5 = vcmp.eq.f32.partialorder %v1925_v44, %v2033_v1  ;;  %v950_v44 = vand.u32 65535, %v1949_v4  ;;  %v905_v42 = vcvt.f32.s32 %v2033_v1 }
 0x245   : > { %860 = vmin.xlane.f32.xlu1 %v859_v51  ;;  %v901_v29 = vsel %vm900_vm5, %v896_v47, inf  ;;  %v878_v51 = vshll.u32 %v877_v38, 16  ;;  %v864_v2 = vshll.u32 %v863_v22, 16  ;;  %vm1092_vm4 = vcmask 326912  }
 0x246   : > { %v2040_v53 = vpop.xlane.xlu1 %912  ;;  %902 = vmin.xlane.f32.xlu0 %v901_v29  ;;  %v952_v17 = vcvt.s32.f32 %v950_v44  ;;  %v906_v1 = vshll.u32 %v905_v42, 16  ;;  %vm1099_vm5 = vcmask 392512   ;;  %v1115_v22 = vadd.s32 4294967232, %v1882_v35 }
 0x247   : > { %v2042_v7 = vpop.xlane.xlu0 %926  ;;  %vm914_vm6 = vcmp.eq.f32.partialorder %v1934_v48, %v2040_v53 }
 0x248   : > { %v915_v57 = vsel %vm914_vm6, %v910_v6, inf  ;;  %vm928_vm7 = vcmp.eq.f32.partialorder %v1940_v0, %v2042_v7  ;;  %v1006_v0 = vand.u32 65535, %v1965_v12  ;;  %v933_v24 = vcvt.f32.s32 %v2042_v7 }
 0x249   : > { %916 = vmin.xlane.f32.xlu1 %v915_v57  ;;  %v929_v5 = vsel %vm928_vm7, %v924_v59, inf  ;;  %v1087_v57 = vadd.s32 4294967264, %v1882_v35  ;;  %vm1106_vm6 = vcmask 458112   ;;  %vm1113_vm7 = vcmask 523712  }
 0x24a   : > { %v2049_v10 = vpop.xlane.xlu1 %940  ;;  %930 = vmin.xlane.f32.xlu0 %v929_v5  ;;  %v1008_v3 = vcvt.s32.f32 %v1006_v0  ;;  %v934_v59 = vshll.u32 %v933_v24, 16 }
 0x24b   : > { %vm942_vm8 = vcmp.eq.f32.partialorder %v1946_v62, %v2049_v10  ;;  %v1020_v62 = vand.u32 65535, %v1971_v16 }
 0x24c   : > { %v943_v15 = vsel %vm942_vm8, %v938_v56, inf  ;;  %vm1120_vm8 = vcmask 589312  }
 0x24d   : > { %944 = vmin.xlane.f32.xlu1 %v943_v15  ;;  %v2054_v48 = vpop.xlane.xlu0 %954  ;;  %v1022_v30 = vcvt.s32.f32 %v1020_v62 }
 0x24e   : > { %vm956_vm9 = vcmp.eq.f32.partialorder %v1957_v9, %v2054_v48  ;;  %v992_v9 = vand.u32 65535, %v1986_v23  ;;  %v961_v5 = vcvt.f32.s32 %v2054_v48 }
 0x24f   : > { %v2059_v4 = vpop.xlane.xlu1 %968  ;;  %v957_v19 = vsel %vm956_vm9, %v952_v17, inf  ;;  %vm1127_vm9 = vcmask 654912  }
 0x250   : > { %958 = vmin.xlane.f32.xlu0 %v957_v19  ;;  %vm970_vm10 = vcmp.eq.f32.partialorder %v1962_v11, %v2059_v4  ;;  %v1034_v11 = vand.u32 65535, %v1994_v27  ;;  %v994_v40 = vcvt.s32.f32 %v992_v9 }
 0x251   : > { %v971_v8 = vsel %vm970_vm10, %v966_v61, inf  ;;  %vm1134_vm10 = vcmask 720512  }
 0x252   : > { %972 = vmin.xlane.f32.xlu1 %v971_v8  ;;  %v1036_v41 = vcvt.s32.f32 %v1034_v11 }
 0x253   : > { %v2065_v25 = vpop.xlane.xlu0 %1010 }
 0x254   : > { %vm1012_vm11 = vcmp.eq.f32.partialorder %v1974_v18, %v2065_v25  ;;  %v1048_v18 = vand.u32 65535, %v2002_v31 }
 0x255   : > { %v2070_v12 = vpop.xlane.xlu1 %1024  ;;  %v1013_v28 = vsel %vm1012_vm11, %v1008_v3, inf  ;;  %vm1141_vm11 = vcmask 786112  }
 0x256   : > { %1014 = vmin.xlane.f32.xlu0 %v1013_v28  ;;  %vm1026_vm12 = vcmp.eq.f32.partialorder %v1982_v21, %v2070_v12  ;;  %v1050_v31 = vcvt.s32.f32 %v1048_v18 }
 0x257   : > { %v2075_v16 = vpop.xlane.xlu0 %982  ;;  %v1027_v20 = vsel %vm1026_vm12, %v1022_v30, inf  ;;  %vm1148_vm12 = vcmask 851712  }
 0x258   : > { %1028 = vmin.xlane.f32.xlu1 %v1027_v20  ;;  %vm984_vm13 = vcmp.eq.f32.partialorder %v1990_v26, %v2075_v16 }
 0x259   : > { %v2080_v23 = vpop.xlane.xlu1 %996  ;;  %v985_v32 = vsel %vm984_vm13, %v980_v37, inf  ;;  %vm1155_vm13 = vcmask 917312  }
 0x25a   : > { %986 = vmin.xlane.f32.xlu0 %v985_v32  ;;  %vm998_vm14 = vcmp.eq.f32.partialorder %v1998_v55, %v2080_v23  ;;  %v2093_v55 = vshrl.u32 %v804_v33, 7  ;;  %v947_v33 = vcvt.f32.s32 %v2049_v10 }
 0x25b   : > { %v2084_v21 = vpop.xlane.xlu0 %1038  ;;  %v999_v27 = vsel %vm998_vm14, %v994_v40, inf  ;;  %v1108_v40 = vadd.s32 4294967240, %v1882_v35  ;;  %vm1162_vm14 = vcmask 982912  }
 0x25c   : > { %1000 = vmin.xlane.f32.xlu1 %v999_v27  ;;  %vm1040_vm15 = vcmp.eq.f32.partialorder %v2005_v36, %v2084_v21  ;;  %v891_v36 = vcvt.f32.s32 %v2020_v34  ;;  %v1076_v60 = vsub.s32 %v1073_v50, %v2093_v55  ;;  %v948_v44 = vshll.u32 %v947_v33, 16 }
 0x25d   : > { %v2088_v45 = vpop.xlane.xlu1 %1052  ;;  %v1041_v26 = vsel %vm1040_vm15, %v1036_v41, inf  ;;  %v1083_v10 = vsub.s32 %v1080_v63, %v2093_v55  ;;  %v1064_v15 = vsub.s32 %v1882_v35, %v2093_v55  ;;  %v1069_v0 = vsub.s32 %v1066_v52, %v2093_v55 }
 0x25e   : > { %1042 = vmin.xlane.f32.xlu0 %v1041_v26  ;;  %vm1054_vm0 = vcmp.eq.f32.partialorder %v2009_v13, %v2088_v45  ;;  %v919_v13 = vcvt.f32.s32 %v2040_v53  ;;  %v892_v34 = vshll.u32 %v891_v36, 16  ;;  %v1090_v9 = vsub.s32 %v1087_v57, %v2093_v55 }
 0x25f   : > { %v1055_v46 = vsel %vm1054_vm0, %v1050_v31, inf  ;;  %v1097_v30 = vsub.s32 %v1094_v14, %v2093_v55  ;;  %v1104_v41 = vsub.s32 %v1101_v49, %v2093_v55  ;;  %v1111_v24 = vsub.s32 %v1108_v40, %v2093_v55 }
 0x260   : > { %1056 = vmin.xlane.f32.xlu1 %v1055_v46  ;;  %v920_v53 = vshll.u32 %v919_v13, 16  ;;  %v1031_v14 = vcvt.f32.s32 %v2070_v12  ;;  %v1059_v40 = vcvt.f32.s32 %v2088_v45  ;;  %vm1169_vm15 = vcmask 1048512  }
 0x262   : > { %v1032_v12 = vshll.u32 %v1031_v14, 16 }
 0x2ca   : > { %v875_v54 = vpop.xlane.xlu0 %874 }
 0x2cb   : > { %v876_v6 = vcvt.f32.s32 %v875_v54 }
 0x2cd   : > { %v879_v62 = vadd.s32 %v878_v51, %v876_v6  ;;  %v962_v51 = vshll.u32 %v961_v5, 16  ;;  %v1017_v5 = vcvt.f32.s32 %v2065_v25  ;;  %v1143_v25 = vadd.s32 4294967200, %v1882_v35 }
 0x2ce   : > { %v889_v47 = vpop.xlane.xlu1 %888  ;;  %v847_v43 = vpop.xlane.xlu0 %846 }
 0x2cf   : > { %v848_v29 = vcvt.f32.s32 %v847_v43  ;;  %v890_v7 = vcvt.f32.s32 %v889_v47  ;;  %v1077_v27 = vrot.slane %v879_v62, %v1076_v60  ;;  %v975_v60 = vcvt.f32.s32 %v2059_v4 }
 0x2d0   : > { %v1122_v43 = vadd.s32 4294967224, %v1882_v35  ;;  %v1003_v62 = vcvt.f32.s32 %v2080_v23 }
 0x2d1   : > { %v851_v17 = vadd.s32 %v850_v58, %v848_v29  ;;  %v893_v3 = vadd.s32 %v892_v34, %v890_v7 }
 0x2d2   : > { %v861_v56 = vpop.xlane.xlu1 %860  ;;  %v1125_v7 = vsub.s32 %v1122_v43, %v2093_v55 }
 0x2d3   : > { %v862_v19 = vcvt.f32.s32 %v861_v56  ;;  %v903_v61 = vpop.xlane.xlu0 %902  ;;  %v1065_v20 = vrot.slane %v851_v17, %v1064_v15  ;;  %v1084_v31 = vrot.slane %v893_v3, %v1083_v10  ;;  %v989_v17 = vcvt.f32.s32 %v2075_v16 }
 0x2d4   : > { %v904_v8 = vcvt.f32.s32 %v903_v61  ;;  %v1129_v61 = vadd.s32 4294967216, %v1882_v35  ;;  %v1018_v3 = vshll.u32 %v1017_v5, 16 }
 0x2d5   : > { %v865_v48 = vadd.s32 %v864_v2, %v862_v19  ;;  %v1118_v2 = vsub.s32 %v1115_v22, %v2093_v55 }
 0x2d6   : > { %v907_v28 = vadd.s32 %v906_v1, %v904_v8  ;;  %v917_v11 = vpop.xlane.xlu1 %916  ;;  %v1045_v8 = vcvt.f32.s32 %v2084_v21  ;;  %v1132_v23 = vsub.s32 %v1129_v61, %v2093_v55 }
 0x2d7   : > { %v1070_v37 = vrot.slane %v865_v48, %v1069_v0  ;;  %v918_v18 = vcvt.f32.s32 %v917_v11  ;;  %v931_v32 = vpop.xlane.xlu0 %930  ;;  %v1157_v11 = vadd.s32 4294967184, %v1882_v35 }
 0x2d8   : > { %v932_v26 = vcvt.f32.s32 %v931_v32  ;;  %v1091_v38 = vrot.slane %v907_v28, %v1090_v9  ;;  %v1136_v9 = vadd.s32 4294967208, %v1882_v35  ;;  %v1046_v32 = vshll.u32 %v1045_v8, 16 }
 0x2d9   : > { %v1072_v46 = vsel %vm1071_vm1, %v1070_v37, %v1065_v20  ;;  %v921_v50 = vadd.s32 %v920_v53, %v918_v18  ;;  %v990_v20 = vshll.u32 %v989_v17, 16  ;;  %v1004_v18 = vshll.u32 %v1003_v62, 16 }
 0x2da   : > { %v1079_v54 = vsel %vm1078_vm2, %v1077_v27, %v1072_v46  ;;  %v935_v36 = vadd.s32 %v934_v59, %v932_v26  ;;  %v945_v39 = vpop.xlane.xlu1 %944  ;;  %v976_v59 = vshll.u32 %v975_v60, 16  ;;  %v1146_v26 = vsub.s32 %v1143_v25, %v2093_v55 }
 0x2db   : > { %v1086_v42 = vsel %vm1085_vm3, %v1084_v31, %v1079_v54  ;;  %v1098_v13 = vrot.slane %v921_v50, %v1097_v30  ;;  %v946_v33 = vcvt.f32.s32 %v945_v39  ;;  %v1150_v30 = vadd.s32 4294967192, %v1882_v35 }
 0x2dc   : > { %v1093_v63 = vsel %vm1092_vm4, %v1091_v38, %v1086_v42  ;;  %v1105_v47 = vrot.slane %v935_v36, %v1104_v41  ;;  %v1164_v41 = vadd.s32 4294967176, %v1882_v35  ;;  %v1139_v46 = vsub.s32 %v1136_v9, %v2093_v55 }
 0x2dd   : > { %v1100_v34 = vsel %vm1099_vm5, %v1098_v13, %v1093_v63  ;;  %v949_v29 = vadd.s32 %v948_v44, %v946_v33  ;;  %v959_v52 = vpop.xlane.xlu0 %958  ;;  %v1153_v38 = vsub.s32 %v1150_v30, %v2093_v55  ;;  %v1160_v36 = vsub.s32 %v1157_v11, %v2093_v55 }
 0x2de   : > { %v1107_v58 = vsel %vm1106_vm6, %v1105_v47, %v1100_v34  ;;  %v960_v1 = vcvt.f32.s32 %v959_v52  ;;  %v1167_v35 = vsub.s32 %v1164_v41, %v2093_v55 }
 0x2df   : > { %v1112_v6 = vrot.slane %v949_v29, %v1111_v24  ;;  %v973_v53 = vpop.xlane.xlu1 %972  ;;  %v1060_v24 = vshll.u32 %v1059_v40, 16 }
 0x2e0   : > { %v963_v4 = vadd.s32 %v962_v51, %v960_v1  ;;  %v974_v57 = vcvt.f32.s32 %v973_v53 }
 0x2e1   : > { %v1114_v10 = vsel %vm1113_vm7, %v1112_v6, %v1107_v58 }
 0x2e2   : > { %v1119_v56 = vrot.slane %v963_v4, %v1118_v2  ;;  %v977_v44 = vadd.s32 %v976_v59, %v974_v57 }
 0x2e3   : > { %v1015_v15 = vpop.xlane.xlu0 %1014 }
 0x2e4   : > { %v1121_v0 = vsel %vm1120_vm8, %v1119_v56, %v1114_v10  ;;  %v1126_v19 = vrot.slane %v977_v44, %v1125_v7  ;;  %v1016_v28 = vcvt.f32.s32 %v1015_v15 }
 0x2e5   : > { %v1029_v49 = vpop.xlane.xlu1 %1028 }
 0x2e6   : > { %v1128_v48 = vsel %vm1127_vm9, %v1126_v19, %v1121_v0  ;;  %v1030_v37 = vcvt.f32.s32 %v1029_v49  ;;  %v1019_v54 = vadd.s32 %v1018_v3, %v1016_v28 }
 0x2e7   : > { %v987_v16 = vpop.xlane.xlu0 %986 }
 0x2e8   : > { %v988_v21 = vcvt.f32.s32 %v987_v16  ;;  %v1033_v22 = vadd.s32 %v1032_v12, %v1030_v37  ;;  %v1147_v51 = vrot.slane %v1019_v54, %v1146_v26 }
 0x2e9   : > { %v1001_v27 = vpop.xlane.xlu1 %1000 }
 0x2ea   : > { %v991_v31 = vadd.s32 %v990_v20, %v988_v21  ;;  %v1002_v50 = vcvt.f32.s32 %v1001_v27  ;;  %v1154_v34 = vrot.slane %v1033_v22, %v1153_v38 }
 0x2eb   : > { %v1043_v39 = vpop.xlane.xlu0 %1042 }
 0x2ec   : > { %v1133_v42 = vrot.slane %v991_v31, %v1132_v23  ;;  %v1005_v45 = vadd.s32 %v1004_v18, %v1002_v50  ;;  %v1044_v13 = vcvt.f32.s32 %v1043_v39 }
 0x2ed   : > { %v1057_v33 = vpop.xlane.xlu1 %1056 }
 0x2ee   : > { %v1135_v60 = vsel %vm1134_vm10, %v1133_v42, %v1128_v48  ;;  %v1140_v63 = vrot.slane %v1005_v45, %v1139_v46  ;;  %v1047_v47 = vadd.s32 %v1046_v32, %v1044_v13  ;;  %v1058_v43 = vcvt.f32.s32 %v1057_v33 }
 0x2f0   : > { %v1142_v29 = vsel %vm1141_vm11, %v1140_v63, %v1135_v60  ;;  %v1161_v52 = vrot.slane %v1047_v47, %v1160_v36  ;;  %v1061_v58 = vadd.s32 %v1060_v24, %v1058_v43 }
 0x2f1   : > { %v1149_v55 = vsel %vm1148_vm12, %v1147_v51, %v1142_v29 }
 0x2f2   : > { %v1168_v2 = vrot.slane %v1061_v58, %v1167_v35  ;;  %v1156_v1 = vsel %vm1155_vm13, %v1154_v34, %v1149_v55 }
 0x2f3   : > { %v1163_v6 = vsel %vm1162_vm14, %v1161_v52, %v1156_v1 }
 0x2f4   : > { %v1170_v53 = vsel %vm1169_vm15, %v1168_v2, %v1163_v6 }
 0x2f5   : > { %1171 = vst [vmem:[%s189_s21] sm:$0x1] %v1170_v53 }
 0x2f6   : > { %1558 = shalt.err (!%p1555_p5)
}
 0x2f7   : > { %s1559_s7 = scalar_lea.hbm %s2156_s28, 16  ;;  %s1563_s10 = scalar_lea.hbm %s2208_s3, 32 }
 0x2f8   : > { %p1560_p6 = scmp.ne.s32.totalorder %s2156_s28, %s1559_s7  ;;  %p1564_p10 = scmp.lt.u32.totalorder %s2156_s28, %s2208_s3 }
 0x2f9   : > { %p1565_p11 = scmp.lt.u32.totalorder %s1563_s10, %s1559_s7  ;;  %p1567_p13 = scmp.lt.u32.totalorder %s1559_s7, %s2156_s28 }
 0x2fa   : > { %p1561_p7 = pnand %p1560_p6, %p1686_p4 }
 0x2fb   : > { %p1566_p12 = por %p1565_p11, %p1564_p10 }
 0x2fc   : > { %p1562_p9 = pneg %p1561_p7 }
 0x2fd   : > { %p1568_p0 = por %p1567_p13, %p1566_p12 }
 0x2ff   : > { %p1569_p1 = pnand %p1568_p0, %p1562_p9 }
 0x301   : > { %1572 = shalt.err (!%p1569_p1)
}
 0x302   : > { %1438 = dma.vmem_to_hbm [thread:$0]  (%p1686_p4), %s2158_s23, 16, %s2156_s28, %s1173_s15  }
 0x303 PF: > { %p1444_p2 = scmp.ge.s32.totalorder %s1623_s17, 2  ;;  %s1198_s18 = sand.u32 1, %s1603_s12  }
 0x304   : > { %s1199_s19 = scalar_lea.sflag [#allocation3], %s1198_s18 }
 0x305   : > { %p1441_p3 = pnand %p1444_p2, %p1693_p8 }
 0x307   : > { %1598 = dma.done.wait (!%p1441_p3), %s1199_s19, 16  }
 0x308   : > { %1600 = vsyncadd (!%p1441_p3), %s1199_s19, 4294967280  ;;  %s16_s17 = sadd.s32 1, %s1623_s17   ;;  %s2211_s12 = smov %s1607_s13 }
 0x309   : > { %p13_p5 = scmp.ge.s32.totalorder %s16_s17, 4   ;;  %s2212_s13 = smov %s1611_s14 }
 0x30a   : > { %s2213_s14 = smov %s1699_s25  ;;  %s2214_s15 = smov %s1619_s16 }
 0x30b   : > { %s2215_s16 = smov %s2217_s20  ;;  %15 = sbr.rel (!%p13_p5) target bundleno = 4 (0x4), region = 67 }
 0x312   :  { %1203 = vsyncpa [#allocation3], 1 }
 0x313   :  { %1205 = vsyncpa [#allocation3 + $0x1], 1 }

</bundles_post_ra>
